<compile_context>
chip_gen: v5e
topology: v5e:2x2
jax: 0.10.0
libtpu: 0.0.40
codegen_flags: <defaults>
</compile_context>

<pallas_src>
import numpy as np

import jax
import jax.numpy as jnp
from jax.experimental import pallas as pl
from jax.experimental.pallas import tpu as pltpu


# ------------------------------ Pallas kernel -------------------------------

def _discriminator_kernel(xe_ref, xo_ref,
                          g1_ref, s1_ref, g2_ref, s2_ref,
                          g3_ref, s3_ref, g4_ref, s4_ref,
                          aw_ref, ab_ref,
                          o_ref,
                          p2_ref, p3_ref, p4_ref):
    """One image per grid step; everything stays in VMEM/vregs.

    xe_ref : (H/2+1, W*C)  bf16  vertically-padded rows 0,2,...,H  (parity split)
    xo_ref : (H/2,   W*C)  bf16  vertically-padded rows 1,3,...,H-1
    g*_ref : (3, Wi*Cin, Wo*Cout) bf16  per-vertical-tap dense weights
                                        (horizontal taps/stride/pad + BN folded in)
    s*_ref : (1, Wo*Cout)  f32   conv_bias*bn_scale + bn_shift, tiled over Wo
    aw_ref : (ds, ds*128)  f32   Linear weight permuted to the kernel layout
    ab_ref : (1, 1)        f32   Linear bias
    o_ref  : (1, 1)        f32   sigmoid(validity) for this image
    p*_ref : VMEM f32 scratches holding the vertically zero-padded activations
    """

    def conv_taps(taps, g_ref, s_ref):
        # 3 accumulated MXU matmuls (K = Wi*Cin), f32 accumulation.
        acc = jnp.dot(taps[0], g_ref[0], preferred_element_type=jnp.float32)
        acc = acc + jnp.dot(taps[1], g_ref[1], preferred_element_type=jnp.float32)
        acc = acc + jnp.dot(taps[2], g_ref[2], preferred_element_type=jnp.float32)
        y = acc + s_ref[...]                     # folded conv bias + BatchNorm
        return jnp.maximum(y, 0.2 * y)           # LeakyReLU(0.2); Dropout2d = id (eval)

    def down_layer(pad_ref, y_prev, g_ref, s_ref):
        # Stash y into a vertically zero-padded scratch, then read the three
        # vertical taps as stride-2 sublane slices (rows 2*oh + ky).
        hi = y_prev.shape[0]
        ho = hi // 2
        pad_ref[...] = jnp.zeros(pad_ref.shape, pad_ref.dtype)
        pad_ref[1:hi + 1, :] = y_prev
        taps = [pad_ref[pl.ds(ky, ho, 2), :].astype(jnp.bfloat16)
                for ky in range(3)]
        return conv_taps(taps, g_ref, s_ref)

    # ---- layer 1: vertical taps are contiguous slices of the parity-split input
    ho1 = xo_ref.shape[0]
    y1 = conv_taps([xe_ref[0:ho1, :],            # padded rows 2*oh
                    xo_ref[...],                 # padded rows 2*oh + 1
                    xe_ref[1:ho1 + 1, :]],       # padded rows 2*oh + 2
                   g1_ref, s1_ref)

    # ---- layers 2..4
    y2 = down_layer(p2_ref, y1, g2_ref, s2_ref)
    y3 = down_layer(p3_ref, y2, g3_ref, s3_ref)
    y4 = down_layer(p4_ref, y3, g4_ref, s4_ref)   # (ds, ds*128) f32

    # ---- head: Linear + exact Sigmoid (no scratch round trip)
    logit = jnp.sum(y4 * aw_ref[...], axis=1, keepdims=True)        # (ds, 1)
    logit = jnp.sum(logit, axis=0, keepdims=True) + ab_ref[...]     # (1, 1)
    o_ref[...] = 1.0 / (1.0 + jnp.exp(-logit))


# ------------------------------- JAX wrapper ---------------------------------

def discriminator_forward(img, kparams):
    """img: (B, C, H, W) float32 NCHW, like the PyTorch module."""
    B, C, H, W = img.shape
    assert H == W and H % 16 == 0, "head permutation assumes square H=W, H%16==0"
    ds = H // 16
    ho1 = H // 2

    # NCHW -> rows=h, lanes=(w*C + c); cast once to bf16 (halves the input DMA).
    x = jnp.transpose(img, (0, 2, 3, 1)).reshape(B, H, W * C).astype(jnp.bfloat16)
    # Vertical zero-pad + row-parity split (pure XLA layout plumbing) so the
    # kernel's layer-1 vertical taps are contiguous unit-stride slices.
    zero_row = jnp.zeros((B, 1, W * C), jnp.bfloat16)
    x_ev = jnp.concatenate([zero_row, x[:, 1::2, :]], axis=1)   # padded rows 0,2,...,H
    x_od = x[:, 0::2, :]                                        # padded rows 1,3,...,H-1

    args = [x_ev, x_od]
    in_specs = [
        pl.BlockSpec((None, ho1 + 1, W * C), lambda b: (b, 0, 0)),
        pl.BlockSpec((None, ho1, W * C), lambda b: (b, 0, 0)),
    ]
    for layer in kparams["layers"]:
        g, s = layer["g"], layer["shift"]
        args += [g, s]
        in_specs += [pl.BlockSpec(g.shape, lambda b: (0, 0, 0)),
                     pl.BlockSpec(s.shape, lambda b: (0, 0))]
    args += [kparams["adv_w"], kparams["adv_b"]]
    in_specs += [pl.BlockSpec(kparams["adv_w"].shape, lambda b: (0, 0)),
                 pl.BlockSpec(kparams["adv_b"].shape, lambda b: (0, 0))]

    # Vertically padded activation scratches for layers 2-4 (f32 so the
    # stride-2 vertical-tap reads are plain sublane-strided loads).
    scratch = [
        pltpu.VMEM((H // 2 + 2, (W // 2) * 16), jnp.float32),
        pltpu.VMEM((H // 4 + 2, (W // 4) * 32), jnp.float32),
        pltpu.VMEM((H // 8 + 2, (W // 8) * 64), jnp.float32),
    ]

    out = pl.pallas_call(
        _discriminator_kernel,
        out_shape=jax.ShapeDtypeStruct((B, 1, 1), jnp.float32),
        grid=(B,),
        in_specs=in_specs,
        out_specs=pl.BlockSpec((None, 1, 1), lambda b: (b, 0, 0)),
        scratch_shapes=scratch,
        compiler_params=pltpu.CompilerParams(
            dimension_semantics=("parallel",)),
    )(*args)
    return out.reshape(B, 1)


# ------------------------- parameter / constant prep -------------------------

def init_params(key, img_shape):
    """Synthetic PyTorch-like parameters; returns (raw, kernel-prepared)."""
    c_in, H, W = img_shape
    assert H == W and H % 16 == 0
    eps = 0.8
    channels = [c_in, 16, 32, 64, 128]
    has_bn = [False, True, True, True]

    raw_convs, kern_layers = [], []
    h, w = H, W
    k = key
    for li in range(4):
        cin, cout = channels[li], channels[li + 1]
        wo = w // 2
        k, kw, kb = jax.random.split(k, 3)
        bound = 1.0 / float(np.sqrt(cin * 9.0))
        wgt = jax.random.uniform(kw, (cout, cin, 3, 3), jnp.float32, -bound, bound)
        bias = jax.random.uniform(kb, (cout,), jnp.float32, -bound, bound)
        raw_convs.append(dict(w=wgt, b=bias, bn=has_bn[li]))

        # Eval-mode BatchNorm2d(cout, eps=0.8): running stats 0/1, affine 1/0.
        scale = 1.0 / float(np.sqrt(1.0 + eps)) if has_bn[li] else 1.0
        wf = np.asarray(wgt, np.float32) * scale             # (cout, cin, 3, 3)
        shift = np.asarray(bias, np.float32) * scale         # (+ bn_shift == 0)

        # Dense per-vertical-tap weight:
        #   G[ky][w_in*cin + ci, ow*cout + co] = wf[co, ci, ky, kx]
        #   where kx = w_in - 2*ow + 1 in {0,1,2} (out-of-range == zero padding).
        G = np.zeros((3, w * cin, wo * cout), np.float32)
        for ky in range(3):
            for kx in range(3):
                blk = wf[:, :, ky, kx].T                      # (cin, cout)
                for ow in range(wo):
                    w_in = 2 * ow + kx - 1
                    if 0 <= w_in < w:
                        G[ky, w_in * cin:(w_in + 1) * cin,
                          ow * cout:(ow + 1) * cout] = blk
        shift_row = np.tile(shift, wo).reshape(1, wo * cout)

        kern_layers.append(dict(g=jnp.asarray(G, jnp.bfloat16),
                                shift=jnp.asarray(shift_row, jnp.float32)))
        h, w = h // 2, wo

    ds = H // 16
    feat = 128 * ds * ds
    k, kw, kb = jax.random.split(k, 3)
    bound = 1.0 / float(np.sqrt(float(feat)))
    adv_w = jax.random.uniform(kw, (1, feat), jnp.float32, -bound, bound)
    adv_b = jax.random.uniform(kb, (1,), jnp.float32, -bound, bound)
    # PyTorch flattens NCHW (f = c*ds*ds + h*ds + w); the kernel keeps the
    # activation as (h, w*128 + c), so permute the Linear weight once.
    aw = jnp.transpose(adv_w.reshape(128, ds, ds), (1, 2, 0)).reshape(ds, ds * 128)

    raw = dict(convs=raw_convs, adv_w=adv_w, adv_b=adv_b, eps=eps)
    kern = dict(layers=kern_layers,
                adv_w=aw.astype(jnp.float32),
                adv_b=adv_b.reshape(1, 1).astype(jnp.float32))
    return raw, kern


# ----------------------------- pure-JAX reference ----------------------------

def reference_forward(img, raw):
    x = img
    for layer in raw["convs"]:
        x = jax.lax.conv_general_dilated(
            x, layer["w"], window_strides=(2, 2), padding=((1, 1), (1, 1)),
            dimension_numbers=("NCHW", "OIHW", "NCHW"))
        x = x + layer["b"][None, :, None, None]
        if layer["bn"]:
            x = x / jnp.sqrt(1.0 + raw["eps"])     # eval-mode BN (stats 0/1)
        x = jnp.maximum(x, 0.2 * x)                # LeakyReLU(0.2)
    flat = x.reshape(x.shape[0], -1)
    logit = flat @ raw["adv_w"].T + raw["adv_b"]
    return jax.nn.sigmoid(logit)


# ------------------------------------ main -----------------------------------

if __name__ == "__main__":
    key = jax.random.PRNGKey(0)
    img_shape = (4, 16, 16)        # (C, H, W); H divisible by 16 => ds_size = 1
    batch = 2

    raw, kern = init_params(key, img_shape)
    img = jax.random.normal(jax.random.fold_in(key, 123),
                            (batch,) + img_shape, dtype=jnp.float32)

    fwd = jax.jit(discriminator_forward)
    out = jax.block_until_ready(fwd(img, kern))

    assert out.shape == (batch, 1), out.shape
    assert bool(jnp.all(jnp.isfinite(out)))
    assert bool(jnp.all((out >= 0.0) & (out <= 1.0)))     # exact sigmoid range

    ref = reference_forward(img, raw)
    assert bool(jnp.all(jnp.abs(out - ref) < 3e-2)), (out, ref)   # bf16 tolerance
    print("KERNEL_OK")
</pallas_src>

<mosaic_0001>
module attributes {stable_mosaic.version = 11 : i64} {
  func.func @_discriminator_kernel(%arg0: i32, %arg1: memref<1x9x64xbf16, #tpu.memory_space<vmem>>, %arg2: memref<1x8x64xbf16, #tpu.memory_space<vmem>>, %arg3: memref<3x64x128xbf16, #tpu.memory_space<vmem>>, %arg4: memref<1x128xf32, #tpu.memory_space<vmem>>, %arg5: memref<3x128x128xbf16, #tpu.memory_space<vmem>>, %arg6: memref<1x128xf32, #tpu.memory_space<vmem>>, %arg7: memref<3x128x128xbf16, #tpu.memory_space<vmem>>, %arg8: memref<1x128xf32, #tpu.memory_space<vmem>>, %arg9: memref<3x128x128xbf16, #tpu.memory_space<vmem>>, %arg10: memref<1x128xf32, #tpu.memory_space<vmem>>, %arg11: memref<1x128xf32, #tpu.memory_space<vmem>>, %arg12: memref<1x1xf32, #tpu.memory_space<vmem>>, %arg13: memref<1x1x1xf32, #tpu.memory_space<vmem>>, %arg14: memref<10x128xf32, #tpu.memory_space<vmem>>, %arg15: memref<6x128xf32, #tpu.memory_space<vmem>>, %arg16: memref<4x128xf32, #tpu.memory_space<vmem>>) attributes {dimension_semantics = [#tpu.dimension_semantics<parallel>], iteration_bounds = array<i64: 2>, scalar_prefetch = 0 : i64, scratch_operands = 3 : i64, tpu.core_type = #tpu.core_type<tc>, window_params = [{transform_indices = @transform_0, window_bounds = array<i64: 1, 9, 64>}, {transform_indices = @transform_1, window_bounds = array<i64: 1, 8, 64>}, {pipeline_mode = #tpu.pipeline_mode<synchronous>, transform_indices = @transform_2, window_bounds = array<i64: 3, 64, 128>}, {pipeline_mode = #tpu.pipeline_mode<synchronous>, transform_indices = @transform_3, window_bounds = array<i64: 1, 128>}, {pipeline_mode = #tpu.pipeline_mode<synchronous>, transform_indices = @transform_4, window_bounds = array<i64: 3, 128, 128>}, {pipeline_mode = #tpu.pipeline_mode<synchronous>, transform_indices = @transform_5, window_bounds = array<i64: 1, 128>}, {pipeline_mode = #tpu.pipeline_mode<synchronous>, transform_indices = @transform_6, window_bounds = array<i64: 3, 128, 128>}, {pipeline_mode = #tpu.pipeline_mode<synchronous>, transform_indices = @transform_7, window_bounds = array<i64: 1, 128>}, {pipeline_mode = #tpu.pipeline_mode<synchronous>, transform_indices = @transform_8, window_bounds = array<i64: 3, 128, 128>}, {pipeline_mode = #tpu.pipeline_mode<synchronous>, transform_indices = @transform_9, window_bounds = array<i64: 1, 128>}, {pipeline_mode = #tpu.pipeline_mode<synchronous>, transform_indices = @transform_10, window_bounds = array<i64: 1, 128>}, {pipeline_mode = #tpu.pipeline_mode<synchronous>, transform_indices = @transform_11, window_bounds = array<i64: 1, 1>}, {transform_indices = @transform_12, window_bounds = array<i64: 1, 1, 1>}]} {
    %c0 = arith.constant 0 : index
    %c0_0 = arith.constant 0 : index
    %c0_1 = arith.constant 0 : index
    %0 = vector.load %arg1[%c0, %c0_0, %c0_1] : memref<1x9x64xbf16, #tpu.memory_space<vmem>>, vector<1x8x64xbf16>
    %1 = vector.shape_cast %0 : vector<1x8x64xbf16> to vector<8x64xbf16>
    %c0_2 = arith.constant 0 : index
    %c0_3 = arith.constant 0 : index
    %c0_4 = arith.constant 0 : index
    %2 = vector.load %arg2[%c0_2, %c0_3, %c0_4] : memref<1x8x64xbf16, #tpu.memory_space<vmem>>, vector<1x8x64xbf16>
    %3 = vector.shape_cast %2 : vector<1x8x64xbf16> to vector<8x64xbf16>
    %c0_5 = arith.constant 0 : index
    %c1 = arith.constant 1 : index
    %c0_6 = arith.constant 0 : index
    %4 = vector.load %arg1[%c0_5, %c1, %c0_6] : memref<1x9x64xbf16, #tpu.memory_space<vmem>>, vector<1x8x64xbf16>
    %5 = vector.shape_cast %4 : vector<1x8x64xbf16> to vector<8x64xbf16>
    %c0_7 = arith.constant 0 : index
    %c0_8 = arith.constant 0 : index
    %c0_9 = arith.constant 0 : index
    %6 = vector.load %arg3[%c0_7, %c0_8, %c0_9] : memref<3x64x128xbf16, #tpu.memory_space<vmem>>, vector<1x64x128xbf16>
    %7 = vector.shape_cast %6 : vector<1x64x128xbf16> to vector<64x128xbf16>
    %cst = arith.constant dense<0.000000e+00> : vector<8x128xf32>
    %8 = tpu.matmul %1, %7, %cst {dimension_numbers = #tpu.dot_dimension_numbers<[1], [0], [0], [1], [0, 0, 1, 1], [], []>} : vector<8x64xbf16>, vector<64x128xbf16>, vector<8x128xf32> -> vector<8x128xf32>
    %c1_10 = arith.constant 1 : index
    %c0_11 = arith.constant 0 : index
    %c0_12 = arith.constant 0 : index
    %9 = vector.load %arg3[%c1_10, %c0_11, %c0_12] : memref<3x64x128xbf16, #tpu.memory_space<vmem>>, vector<1x64x128xbf16>
    %10 = vector.shape_cast %9 : vector<1x64x128xbf16> to vector<64x128xbf16>
    %cst_13 = arith.constant dense<0.000000e+00> : vector<8x128xf32>
    %11 = tpu.matmul %3, %10, %cst_13 {dimension_numbers = #tpu.dot_dimension_numbers<[1], [0], [0], [1], [0, 0, 1, 1], [], []>} : vector<8x64xbf16>, vector<64x128xbf16>, vector<8x128xf32> -> vector<8x128xf32>
    %12 = arith.addf %8, %11 : vector<8x128xf32>
    %c2 = arith.constant 2 : index
    %c0_14 = arith.constant 0 : index
    %c0_15 = arith.constant 0 : index
    %13 = vector.load %arg3[%c2, %c0_14, %c0_15] : memref<3x64x128xbf16, #tpu.memory_space<vmem>>, vector<1x64x128xbf16>
    %14 = vector.shape_cast %13 : vector<1x64x128xbf16> to vector<64x128xbf16>
    %cst_16 = arith.constant dense<0.000000e+00> : vector<8x128xf32>
    %15 = tpu.matmul %5, %14, %cst_16 {dimension_numbers = #tpu.dot_dimension_numbers<[1], [0], [0], [1], [0, 0, 1, 1], [], []>} : vector<8x64xbf16>, vector<64x128xbf16>, vector<8x128xf32> -> vector<8x128xf32>
    %16 = arith.addf %12, %15 : vector<8x128xf32>
    %c0_17 = arith.constant 0 : index
    %c0_18 = arith.constant 0 : index
    %17 = vector.load %arg4[%c0_17, %c0_18] : memref<1x128xf32, #tpu.memory_space<vmem>>, vector<1x128xf32>
    %18 = vector.broadcast %17 : vector<1x128xf32> to vector<8x128xf32>
    %19 = arith.addf %16, %18 : vector<8x128xf32>
    %cst_19 = arith.constant 2.000000e-01 : f32
    %20 = vector.broadcast %cst_19 : f32 to vector<8x128xf32>
    %21 = arith.mulf %20, %19 : vector<8x128xf32>
    %22 = arith.maximumf %19, %21 : vector<8x128xf32>
    %cst_20 = arith.constant 0.000000e+00 : f32
    %23 = vector.broadcast %cst_20 : f32 to vector<10x128xf32>
    %c0_21 = arith.constant 0 : index
    %c0_22 = arith.constant 0 : index
    %24 = vector.load %arg14[%c0_21, %c0_22] : memref<10x128xf32, #tpu.memory_space<vmem>>, vector<10x128xf32>
    tpu.vector_store %arg14[%c0_21, %c0_22], %23 {strides = array<i32>} : memref<10x128xf32, #tpu.memory_space<vmem>>, vector<10x128xf32>,
    %c1_23 = arith.constant 1 : index
    %c0_24 = arith.constant 0 : index
    %25 = vector.load %arg14[%c1_23, %c0_24] : memref<10x128xf32, #tpu.memory_space<vmem>>, vector<8x128xf32>
    tpu.vector_store %arg14[%c1_23, %c0_24], %22 {strides = array<i32>} : memref<10x128xf32, #tpu.memory_space<vmem>>, vector<8x128xf32>,
    %c0_25 = arith.constant 0 : index
    %c0_26 = arith.constant 0 : index
    %26 = tpu.strided_load %arg14[%c0_25, %c0_26] {strides = array<i32: 2, 1>} : memref<10x128xf32, #tpu.memory_space<vmem>>, vector<4x128xf32>
    %27 = arith.truncf %26 : vector<4x128xf32> to vector<4x128xbf16>
    %c1_27 = arith.constant 1 : index
    %c0_28 = arith.constant 0 : index
    %28 = tpu.strided_load %arg14[%c1_27, %c0_28] {strides = array<i32: 2, 1>} : memref<10x128xf32, #tpu.memory_space<vmem>>, vector<4x128xf32>
    %29 = arith.truncf %28 : vector<4x128xf32> to vector<4x128xbf16>
    %c2_29 = arith.constant 2 : index
    %c0_30 = arith.constant 0 : index
    %30 = tpu.strided_load %arg14[%c2_29, %c0_30] {strides = array<i32: 2, 1>} : memref<10x128xf32, #tpu.memory_space<vmem>>, vector<4x128xf32>
    %31 = arith.truncf %30 : vector<4x128xf32> to vector<4x128xbf16>
    %c0_31 = arith.constant 0 : index
    %c0_32 = arith.constant 0 : index
    %c0_33 = arith.constant 0 : index
    %32 = vector.load %arg5[%c0_31, %c0_32, %c0_33] : memref<3x128x128xbf16, #tpu.memory_space<vmem>>, vector<1x128x128xbf16>
    %33 = vector.shape_cast %32 : vector<1x128x128xbf16> to vector<128x128xbf16>
    %cst_34 = arith.constant dense<0.000000e+00> : vector<4x128xf32>
    %34 = tpu.matmul %27, %33, %cst_34 {dimension_numbers = #tpu.dot_dimension_numbers<[1], [0], [0], [1], [0, 0, 1, 1], [], []>} : vector<4x128xbf16>, vector<128x128xbf16>, vector<4x128xf32> -> vector<4x128xf32>
    %c1_35 = arith.constant 1 : index
    %c0_36 = arith.constant 0 : index
    %c0_37 = arith.constant 0 : index
    %35 = vector.load %arg5[%c1_35, %c0_36, %c0_37] : memref<3x128x128xbf16, #tpu.memory_space<vmem>>, vector<1x128x128xbf16>
    %36 = vector.shape_cast %35 : vector<1x128x128xbf16> to vector<128x128xbf16>
    %cst_38 = arith.constant dense<0.000000e+00> : vector<4x128xf32>
    %37 = tpu.matmul %29, %36, %cst_38 {dimension_numbers = #tpu.dot_dimension_numbers<[1], [0], [0], [1], [0, 0, 1, 1], [], []>} : vector<4x128xbf16>, vector<128x128xbf16>, vector<4x128xf32> -> vector<4x128xf32>
    %38 = arith.addf %34, %37 : vector<4x128xf32>
    %c2_39 = arith.constant 2 : index
    %c0_40 = arith.constant 0 : index
    %c0_41 = arith.constant 0 : index
    %39 = vector.load %arg5[%c2_39, %c0_40, %c0_41] : memref<3x128x128xbf16, #tpu.memory_space<vmem>>, vector<1x128x128xbf16>
    %40 = vector.shape_cast %39 : vector<1x128x128xbf16> to vector<128x128xbf16>
    %cst_42 = arith.constant dense<0.000000e+00> : vector<4x128xf32>
    %41 = tpu.matmul %31, %40, %cst_42 {dimension_numbers = #tpu.dot_dimension_numbers<[1], [0], [0], [1], [0, 0, 1, 1], [], []>} : vector<4x128xbf16>, vector<128x128xbf16>, vector<4x128xf32> -> vector<4x128xf32>
    %42 = arith.addf %38, %41 : vector<4x128xf32>
    %c0_43 = arith.constant 0 : index
    %c0_44 = arith.constant 0 : index
    %43 = vector.load %arg6[%c0_43, %c0_44] : memref<1x128xf32, #tpu.memory_space<vmem>>, vector<1x128xf32>
    %44 = vector.broadcast %43 : vector<1x128xf32> to vector<4x128xf32>
    %45 = arith.addf %42, %44 : vector<4x128xf32>
    %cst_45 = arith.constant 2.000000e-01 : f32
    %46 = vector.broadcast %cst_45 : f32 to vector<4x128xf32>
    %47 = arith.mulf %46, %45 : vector<4x128xf32>
    %48 = arith.maximumf %45, %47 : vector<4x128xf32>
    %cst_46 = arith.constant 0.000000e+00 : f32
    %49 = vector.broadcast %cst_46 : f32 to vector<6x128xf32>
    %c0_47 = arith.constant 0 : index
    %c0_48 = arith.constant 0 : index
    %50 = vector.load %arg15[%c0_47, %c0_48] : memref<6x128xf32, #tpu.memory_space<vmem>>, vector<6x128xf32>
    tpu.vector_store %arg15[%c0_47, %c0_48], %49 {strides = array<i32>} : memref<6x128xf32, #tpu.memory_space<vmem>>, vector<6x128xf32>,
    %c1_49 = arith.constant 1 : index
    %c0_50 = arith.constant 0 : index
    %51 = vector.load %arg15[%c1_49, %c0_50] : memref<6x128xf32, #tpu.memory_space<vmem>>, vector<4x128xf32>
    tpu.vector_store %arg15[%c1_49, %c0_50], %48 {strides = array<i32>} : memref<6x128xf32, #tpu.memory_space<vmem>>, vector<4x128xf32>,
    %c0_51 = arith.constant 0 : index
    %c0_52 = arith.constant 0 : index
    %52 = tpu.strided_load %arg15[%c0_51, %c0_52] {strides = array<i32: 2, 1>} : memref<6x128xf32, #tpu.memory_space<vmem>>, vector<2x128xf32>
    %53 = arith.truncf %52 : vector<2x128xf32> to vector<2x128xbf16>
    %c1_53 = arith.constant 1 : index
    %c0_54 = arith.constant 0 : index
    %54 = tpu.strided_load %arg15[%c1_53, %c0_54] {strides = array<i32: 2, 1>} : memref<6x128xf32, #tpu.memory_space<vmem>>, vector<2x128xf32>
    %55 = arith.truncf %54 : vector<2x128xf32> to vector<2x128xbf16>
    %c2_55 = arith.constant 2 : index
    %c0_56 = arith.constant 0 : index
    %56 = tpu.strided_load %arg15[%c2_55, %c0_56] {strides = array<i32: 2, 1>} : memref<6x128xf32, #tpu.memory_space<vmem>>, vector<2x128xf32>
    %57 = arith.truncf %56 : vector<2x128xf32> to vector<2x128xbf16>
    %c0_57 = arith.constant 0 : index
    %c0_58 = arith.constant 0 : index
    %c0_59 = arith.constant 0 : index
    %58 = vector.load %arg7[%c0_57, %c0_58, %c0_59] : memref<3x128x128xbf16, #tpu.memory_space<vmem>>, vector<1x128x128xbf16>
    %59 = vector.shape_cast %58 : vector<1x128x128xbf16> to vector<128x128xbf16>
    %cst_60 = arith.constant dense<0.000000e+00> : vector<2x128xf32>
    %60 = tpu.matmul %53, %59, %cst_60 {dimension_numbers = #tpu.dot_dimension_numbers<[1], [0], [0], [1], [0, 0, 1, 1], [], []>} : vector<2x128xbf16>, vector<128x128xbf16>, vector<2x128xf32> -> vector<2x128xf32>
    %c1_61 = arith.constant 1 : index
    %c0_62 = arith.constant 0 : index
    %c0_63 = arith.constant 0 : index
    %61 = vector.load %arg7[%c1_61, %c0_62, %c0_63] : memref<3x128x128xbf16, #tpu.memory_space<vmem>>, vector<1x128x128xbf16>
    %62 = vector.shape_cast %61 : vector<1x128x128xbf16> to vector<128x128xbf16>
    %cst_64 = arith.constant dense<0.000000e+00> : vector<2x128xf32>
    %63 = tpu.matmul %55, %62, %cst_64 {dimension_numbers = #tpu.dot_dimension_numbers<[1], [0], [0], [1], [0, 0, 1, 1], [], []>} : vector<2x128xbf16>, vector<128x128xbf16>, vector<2x128xf32> -> vector<2x128xf32>
    %64 = arith.addf %60, %63 : vector<2x128xf32>
    %c2_65 = arith.constant 2 : index
    %c0_66 = arith.constant 0 : index
    %c0_67 = arith.constant 0 : index
    %65 = vector.load %arg7[%c2_65, %c0_66, %c0_67] : memref<3x128x128xbf16, #tpu.memory_space<vmem>>, vector<1x128x128xbf16>
    %66 = vector.shape_cast %65 : vector<1x128x128xbf16> to vector<128x128xbf16>
    %cst_68 = arith.constant dense<0.000000e+00> : vector<2x128xf32>
    %67 = tpu.matmul %57, %66, %cst_68 {dimension_numbers = #tpu.dot_dimension_numbers<[1], [0], [0], [1], [0, 0, 1, 1], [], []>} : vector<2x128xbf16>, vector<128x128xbf16>, vector<2x128xf32> -> vector<2x128xf32>
    %68 = arith.addf %64, %67 : vector<2x128xf32>
    %c0_69 = arith.constant 0 : index
    %c0_70 = arith.constant 0 : index
    %69 = vector.load %arg8[%c0_69, %c0_70] : memref<1x128xf32, #tpu.memory_space<vmem>>, vector<1x128xf32>
    %70 = vector.broadcast %69 : vector<1x128xf32> to vector<2x128xf32>
    %71 = arith.addf %68, %70 : vector<2x128xf32>
    %cst_71 = arith.constant 2.000000e-01 : f32
    %72 = vector.broadcast %cst_71 : f32 to vector<2x128xf32>
    %73 = arith.mulf %72, %71 : vector<2x128xf32>
    %74 = arith.maximumf %71, %73 : vector<2x128xf32>
    %cst_72 = arith.constant 0.000000e+00 : f32
    %75 = vector.broadcast %cst_72 : f32 to vector<4x128xf32>
    %c0_73 = arith.constant 0 : index
    %c0_74 = arith.constant 0 : index
    %76 = vector.load %arg16[%c0_73, %c0_74] : memref<4x128xf32, #tpu.memory_space<vmem>>, vector<4x128xf32>
    tpu.vector_store %arg16[%c0_73, %c0_74], %75 {strides = array<i32>} : memref<4x128xf32, #tpu.memory_space<vmem>>, vector<4x128xf32>,
    %c1_75 = arith.constant 1 : index
    %c0_76 = arith.constant 0 : index
    %77 = vector.load %arg16[%c1_75, %c0_76] : memref<4x128xf32, #tpu.memory_space<vmem>>, vector<2x128xf32>
    tpu.vector_store %arg16[%c1_75, %c0_76], %74 {strides = array<i32>} : memref<4x128xf32, #tpu.memory_space<vmem>>, vector<2x128xf32>,
    %c0_77 = arith.constant 0 : index
    %c0_78 = arith.constant 0 : index
    %78 = tpu.strided_load %arg16[%c0_77, %c0_78] {strides = array<i32: 2, 1>} : memref<4x128xf32, #tpu.memory_space<vmem>>, vector<1x128xf32>
    %79 = arith.truncf %78 : vector<1x128xf32> to vector<1x128xbf16>
    %c1_79 = arith.constant 1 : index
    %c0_80 = arith.constant 0 : index
    %80 = tpu.strided_load %arg16[%c1_79, %c0_80] {strides = array<i32: 2, 1>} : memref<4x128xf32, #tpu.memory_space<vmem>>, vector<1x128xf32>
    %81 = arith.truncf %80 : vector<1x128xf32> to vector<1x128xbf16>
    %c2_81 = arith.constant 2 : index
    %c0_82 = arith.constant 0 : index
    %82 = tpu.strided_load %arg16[%c2_81, %c0_82] {strides = array<i32: 2, 1>} : memref<4x128xf32, #tpu.memory_space<vmem>>, vector<1x128xf32>
    %83 = arith.truncf %82 : vector<1x128xf32> to vector<1x128xbf16>
    %c0_83 = arith.constant 0 : index
    %c0_84 = arith.constant 0 : index
    %c0_85 = arith.constant 0 : index
    %84 = vector.load %arg9[%c0_83, %c0_84, %c0_85] : memref<3x128x128xbf16, #tpu.memory_space<vmem>>, vector<1x128x128xbf16>
    %85 = vector.shape_cast %84 : vector<1x128x128xbf16> to vector<128x128xbf16>
    %cst_86 = arith.constant dense<0.000000e+00> : vector<1x128xf32>
    %86 = tpu.matmul %79, %85, %cst_86 {dimension_numbers = #tpu.dot_dimension_numbers<[1], [0], [0], [1], [0, 0, 1, 1], [], []>} : vector<1x128xbf16>, vector<128x128xbf16>, vector<1x128xf32> -> vector<1x128xf32>
    %c1_87 = arith.constant 1 : index
    %c0_88 = arith.constant 0 : index
    %c0_89 = arith.constant 0 : index
    %87 = vector.load %arg9[%c1_87, %c0_88, %c0_89] : memref<3x128x128xbf16, #tpu.memory_space<vmem>>, vector<1x128x128xbf16>
    %88 = vector.shape_cast %87 : vector<1x128x128xbf16> to vector<128x128xbf16>
    %cst_90 = arith.constant dense<0.000000e+00> : vector<1x128xf32>
    %89 = tpu.matmul %81, %88, %cst_90 {dimension_numbers = #tpu.dot_dimension_numbers<[1], [0], [0], [1], [0, 0, 1, 1], [], []>} : vector<1x128xbf16>, vector<128x128xbf16>, vector<1x128xf32> -> vector<1x128xf32>
    %90 = arith.addf %86, %89 : vector<1x128xf32>
    %c2_91 = arith.constant 2 : index
    %c0_92 = arith.constant 0 : index
    %c0_93 = arith.constant 0 : index
    %91 = vector.load %arg9[%c2_91, %c0_92, %c0_93] : memref<3x128x128xbf16, #tpu.memory_space<vmem>>, vector<1x128x128xbf16>
    %92 = vector.shape_cast %91 : vector<1x128x128xbf16> to vector<128x128xbf16>
    %cst_94 = arith.constant dense<0.000000e+00> : vector<1x128xf32>
    %93 = tpu.matmul %83, %92, %cst_94 {dimension_numbers = #tpu.dot_dimension_numbers<[1], [0], [0], [1], [0, 0, 1, 1], [], []>} : vector<1x128xbf16>, vector<128x128xbf16>, vector<1x128xf32> -> vector<1x128xf32>
    %94 = arith.addf %90, %93 : vector<1x128xf32>
    %c0_95 = arith.constant 0 : index
    %c0_96 = arith.constant 0 : index
    %95 = vector.load %arg10[%c0_95, %c0_96] : memref<1x128xf32, #tpu.memory_space<vmem>>, vector<1x128xf32>
    %96 = arith.addf %94, %95 : vector<1x128xf32>
    %cst_97 = arith.constant 2.000000e-01 : f32
    %97 = vector.broadcast %cst_97 : f32 to vector<1x128xf32>
    %98 = arith.mulf %97, %96 : vector<1x128xf32>
    %99 = arith.maximumf %96, %98 : vector<1x128xf32>
    %c0_98 = arith.constant 0 : index
    %c0_99 = arith.constant 0 : index
    %100 = vector.load %arg11[%c0_98, %c0_99] : memref<1x128xf32, #tpu.memory_space<vmem>>, vector<1x128xf32>
    %101 = arith.mulf %99, %100 : vector<1x128xf32>
    %cst_100 = arith.constant dense<0.000000e+00> : vector<1xf32>
    %102 = vector.multi_reduction <add>, %101, %cst_100 [1] : vector<1x128xf32> to vector<1xf32>
    %103 = vector.shape_cast %102 : vector<1xf32> to vector<1x1xf32>
    %cst_101 = arith.constant dense<0.000000e+00> : vector<1xf32>
    %104 = vector.multi_reduction <add>, %103, %cst_101 [0] : vector<1x1xf32> to vector<1xf32>
    %105 = vector.shape_cast %104 : vector<1xf32> to vector<1x1xf32>
    %c0_102 = arith.constant 0 : index
    %c0_103 = arith.constant 0 : index
    %106 = vector.load %arg12[%c0_102, %c0_103] : memref<1x1xf32, #tpu.memory_space<vmem>>, vector<1x1xf32>
    %107 = arith.addf %105, %106 : vector<1x1xf32>
    %cst_104 = arith.constant 0.000000e+00 : f32
    %108 = vector.broadcast %cst_104 : f32 to vector<1x1xf32>
    %109 = arith.subf %108, %107 : vector<1x1xf32>
    %110 = math.exp %109 : vector<1x1xf32>
    %cst_105 = arith.constant 1.000000e+00 : f32
    %111 = vector.broadcast %cst_105 : f32 to vector<1x1xf32>
    %112 = arith.addf %111, %110 : vector<1x1xf32>
    %cst_106 = arith.constant 1.000000e+00 : f32
    %113 = vector.broadcast %cst_106 : f32 to vector<1x1xf32>
    %114 = arith.divf %113, %112 : vector<1x1xf32>
    %c0_107 = arith.constant 0 : index
    %c0_108 = arith.constant 0 : index
    %c0_109 = arith.constant 0 : index
    %115 = vector.load %arg13[%c0_107, %c0_108, %c0_109] : memref<1x1x1xf32, #tpu.memory_space<vmem>>, vector<1x1x1xf32>
    %116 = vector.shape_cast %115 : vector<1x1x1xf32> to vector<1x1xf32>
    %117 = vector.shape_cast %114 : vector<1x1xf32> to vector<1x1x1xf32>
    tpu.vector_store %arg13[%c0_107, %c0_108, %c0_109], %117 {strides = array<i32>} : memref<1x1x1xf32, #tpu.memory_space<vmem>>, vector<1x1x1xf32>,
    return
  }
  func.func @transform_0(%arg0: i32) -> (i32, i32, i32) {
    %c0_i32 = arith.constant 0 : i32
    %c0_i32_0 = arith.constant 0 : i32
    %c0_i32_1 = arith.constant 0 : i32
    return %arg0, %c0_i32, %c0_i32_0 : i32, i32, i32
  }
  func.func @transform_1(%arg0: i32) -> (i32, i32, i32) {
    %c0_i32 = arith.constant 0 : i32
    %c0_i32_0 = arith.constant 0 : i32
    %c0_i32_1 = arith.constant 0 : i32
    return %arg0, %c0_i32, %c0_i32_0 : i32, i32, i32
  }
  func.func @transform_2(%arg0: i32) -> (i32, i32, i32) {
    %c0_i32 = arith.constant 0 : i32
    %c0_i32_0 = arith.constant 0 : i32
    %c0_i32_1 = arith.constant 0 : i32
    %c0_i32_2 = arith.constant 0 : i32
    return %c0_i32, %c0_i32_0, %c0_i32_1 : i32, i32, i32
  }
  func.func @transform_3(%arg0: i32) -> (i32, i32) {
    %c0_i32 = arith.constant 0 : i32
    %c0_i32_0 = arith.constant 0 : i32
    %c0_i32_1 = arith.constant 0 : i32
    return %c0_i32, %c0_i32_0 : i32, i32
  }
  func.func @transform_4(%arg0: i32) -> (i32, i32, i32) {
    %c0_i32 = arith.constant 0 : i32
    %c0_i32_0 = arith.constant 0 : i32
    %c0_i32_1 = arith.constant 0 : i32
    %c0_i32_2 = arith.constant 0 : i32
    return %c0_i32, %c0_i32_0, %c0_i32_1 : i32, i32, i32
  }
  func.func @transform_5(%arg0: i32) -> (i32, i32) {
    %c0_i32 = arith.constant 0 : i32
    %c0_i32_0 = arith.constant 0 : i32
    %c0_i32_1 = arith.constant 0 : i32
    return %c0_i32, %c0_i32_0 : i32, i32
  }
  func.func @transform_6(%arg0: i32) -> (i32, i32, i32) {
    %c0_i32 = arith.constant 0 : i32
    %c0_i32_0 = arith.constant 0 : i32
    %c0_i32_1 = arith.constant 0 : i32
    %c0_i32_2 = arith.constant 0 : i32
    return %c0_i32, %c0_i32_0, %c0_i32_1 : i32, i32, i32
  }
  func.func @transform_7(%arg0: i32) -> (i32, i32) {
    %c0_i32 = arith.constant 0 : i32
    %c0_i32_0 = arith.constant 0 : i32
    %c0_i32_1 = arith.constant 0 : i32
    return %c0_i32, %c0_i32_0 : i32, i32
  }
  func.func @transform_8(%arg0: i32) -> (i32, i32, i32) {
    %c0_i32 = arith.constant 0 : i32
    %c0_i32_0 = arith.constant 0 : i32
    %c0_i32_1 = arith.constant 0 : i32
    %c0_i32_2 = arith.constant 0 : i32
    return %c0_i32, %c0_i32_0, %c0_i32_1 : i32, i32, i32
  }
  func.func @transform_9(%arg0: i32) -> (i32, i32) {
    %c0_i32 = arith.constant 0 : i32
    %c0_i32_0 = arith.constant 0 : i32
    %c0_i32_1 = arith.constant 0 : i32
    return %c0_i32, %c0_i32_0 : i32, i32
  }
  func.func @transform_10(%arg0: i32) -> (i32, i32) {
    %c0_i32 = arith.constant 0 : i32
    %c0_i32_0 = arith.constant 0 : i32
    %c0_i32_1 = arith.constant 0 : i32
    return %c0_i32, %c0_i32_0 : i32, i32
  }
  func.func @transform_11(%arg0: i32) -> (i32, i32) {
    %c0_i32 = arith.constant 0 : i32
    %c0_i32_0 = arith.constant 0 : i32
    %c0_i32_1 = arith.constant 0 : i32
    return %c0_i32, %c0_i32_0 : i32, i32
  }
  func.func @transform_12(%arg0: i32) -> (i32, i32, i32) {
    %c0_i32 = arith.constant 0 : i32
    %c0_i32_0 = arith.constant 0 : i32
    %c0_i32_1 = arith.constant 0 : i32
    return %arg0, %c0_i32, %c0_i32_0 : i32, i32, i32
  }
}

</mosaic_0001>

<bundles_post_ra>
// kernel: discriminator_forward.1
= control target key start
LH: loop header
LB: loop body
LE: loop exit
PB: predicated region body
PF: predicated region fallthrough
CT: control target
= control target key end

     0   :  { %s2399_s0 = inlined_call_operand.vmem [shape: bf16[2,9,64], index: 0, kind: input, shape index: {}]   ;;  %s2400_s1 = inlined_call_operand.vmem [shape: bf16[2,8,64], index: 1, kind: input, shape index: {}]   ;;  %s2401_s2 = inlined_call_operand.hbm [shape: bf16[3,64,128], index: 2, kind: input, shape index: {}]   ;;  %s2402_s3 = inlined_call_operand.vmem [shape: f32[1,128], index: 3, kind: input, shape index: {}]   ;;  %s2403_s4 = inlined_call_operand.vmem [shape: bf16[3,128,128], index: 4, kind: input, shape index: {}]   ;;  %s2404_s5 = inlined_call_operand.vmem [shape: f32[1,128], index: 5, kind: input, shape index: {}]   ;;  %s2405_s6 = inlined_call_operand.vmem [shape: bf16[3,128,128], index: 6, kind: input, shape index: {}]   ;;  %s2406_s7 = inlined_call_operand.vmem [shape: f32[1,128], index: 7, kind: input, shape index: {}]   ;;  %s2407_s8 = inlined_call_operand.hbm [shape: bf16[3,128,128], index: 8, kind: input, shape index: {}]   ;;  %s2408_s9 = inlined_call_operand.vmem [shape: f32[1,128], index: 9, kind: input, shape index: {}]   ;;  %s2409_s10 = inlined_call_operand.vmem [shape: f32[1,128], index: 10, kind: input, shape index: {}]   ;;  %s2410_s11 = inlined_call_operand.<no memory space> [shape: f32[1,1], index: 11, kind: input, shape index: {}]   ;;  %s2411_s12 = inlined_call_operand.vmem [shape: f32[2,1,1], index: 12, kind: output, shape index: {}]  }
   0x1   :  { %v17_v0 = vstv %s2410_s11 }
   0x2   :  { %18 = vst [vmem:[#allocation5] sm:$0x1] %v17_v0 }
   0x3   :  { %19 = vsyncpa [#allocation7], 0 }
   0x4   :  { %20 = vsyncpa [#allocation9], 0  ;;  %s2191_s23 = smov 0  }
   0x5 LB: > { %s330_s26 = sshll.u32 %s2401_s2, 4  ;;  %s1496_s27 = sadd.s32 4294967295, %s2116_s23   ;;  %s2116_s23 = sphi %s2191_s23, %s26_s23   ;;  %s331_s26 = int_to_ptr.hbm [resolvable:$true] %s330_s26 }
   0x6   : > { %p1498_p0 = scmp.ge.s32.totalorder %s2116_s23, 1  ;;  %p319_p1 = scmp.lt.s32.totalorder %s2116_s23, 3 }
   0x7   : > { %p2018_p2 = scmp.eq.s32.totalorder %s1496_s27, 0  ;;  %s2118_s28 = smov [#allocation6]  }
   0x8   : > { %p2202_p3 = pnand %p1498_p0, %p319_p1  ;;  %s332_s29 = sshll.u32 %s2118_s28, 4  ;;  %s333_s29 = int_to_ptr.vmem [resolvable:$true] %s332_s29 }
   0x9   : > { %s359_s14 = sshll.u32 %s2407_s8, 4  ;;  %s2119_s15 = smov [#allocation8]   ;;  %s360_s14 = int_to_ptr.hbm [resolvable:$true] %s359_s14 }
   0xa   : > { %p2011_p4 = pneg %p2202_p3  ;;  %s361_s16 = sshll.u32 %s2119_s15, 4  ;;  %s362_s16 = int_to_ptr.vmem [resolvable:$true] %s361_s16 }
   0xb   : > { %s2120_s17 = smov 64   ;;  %s2121_s18 = smov 4  }
   0xc   : > { %p2012_p5 = pnand %p2018_p2, %p2011_p4  ;;  %401 = sbr.rel (%p2202_p3) target bundleno = 784 (0x310), region = 68 }
   0xe   : > { %2014 = dma.hbm_to_vmem [thread:$0]  (!%p2012_p5), %s331_s26, 1536, %s333_s29, [#allocation7], %s2120_s17, %s2120_s17, %s2121_s18  }
   0xf   : > { %2017 = dma.hbm_to_vmem [thread:$0]  (!%p2012_p5), %s360_s14, 3072, %s362_s16, [#allocation9], %s2120_s17, %s2120_s17, %s2121_s18  }
  0x11   : > { %2107 = dma.done.wait (%p2018_p2), [#allocation7], 1536  }
  0x12   : > { %2109 = vsyncadd (%p2018_p2), [#allocation7], 4294965760 }
  0x13   : > { %2111 = dma.done.wait (%p2018_p2), [#allocation9], 3072  }
  0x14   : > { %2113 = vsyncadd (%p2018_p2), [#allocation9], 4294964224  ;;  %p451_p6 = scmp.lt.s32.totalorder %s1496_s27, 1  ;;  %v1926_v1 = vld [vmem:[#allocation6 + $0x38] sm:$0xff]  ;;  %v1925_v4 = vld [vmem:[#allocation6 + $0x30] sm:$0xff]  ;;  %vm508_vm0 = vcmask 523264  }
  0x15   : > { %v1922_v2 = vld [vmem:[#allocation6 + $0x18] sm:$0xff]  ;;  %516 = vmatpush.bf16.msra.mxu0 %v1926_v1  ;;  %v1921_v5 = vld [vmem:[#allocation6 + $0x10] sm:$0xff]  ;;  %v1924_v10 = vld [vmem:[#allocation6 + $0x28] sm:$0xff]  ;;  %v2122_v40 = vmov 0.0   ;;  %vm1387_vm1 = vcmask 1040384   ;;  %vm1413_vm5 = vcmask 0  }
  0x16   : > { %s2414_s27 = smov (!%p451_p6, %s1496_s27), 1  ;;  %v1930_v3 = vld [vmem:[#allocation6 + $0x58] sm:$0xff]  ;;  %556 = vmatpush.bf16.msra.mxu1 %v1922_v2  ;;  %v1929_v6 = vld [vmem:[#allocation6 + $0x50] sm:$0xff]  ;;  %v1920_v11 = vld [vmem:[#allocation6 + $0x8] sm:$0xff]  ;;  %634 = vst [vmem:[#allocation2] sm:$0xff] %v2122_v40 }
  0x17   : > { %s1917_s19 = sshll.u32 %s2414_s27, 3  ;;  %617 = vmatpush.bf16.msra.mxu2 %v1930_v3  ;;  %v1946_v9 = vld [vmem:[%s2403_s4 + $0x78] sm:$0xff]  ;;  %v1928_v12 = vld [vmem:[#allocation6 + $0x48] sm:$0xff]  ;;  %v1945_v14 = vld [vmem:[%s2403_s4 + $0x70] sm:$0xff]  ;;  %s1507_s28 = sshll.u32 %s2414_s27, 2 }
  0x18   : > { %s2224_s22 = scalar_lea.vmem %s2399_s0, %s1917_s19  ;;  %726 = vmatpush.bf16.msra.mxu3 %v1946_v9  ;;  %v1923_v16 = vld [vmem:[#allocation6 + $0x20] sm:$0xff]  ;;  %s459_s13 = scalar_lea.vmem %s2400_s1, %s1507_s28  ;;  %v1937_v26 = vld [vmem:[%s2403_s4 + $0x30] sm:$0xff]  ;;  %v1944_v28 = vld [vmem:[%s2403_s4 + $0x68] sm:$0xff]  ;;  %635 = vst [vmem:[#allocation2 + $0x8] sm:$0x3] %v2122_v40 }
  0x19   : > { %v1544_v7 = vld [vmem:[%s2224_s22] sm:$0xf]  ;;  %v1918_v8 = vld [vmem:[%s2224_s22] sm:$0x10]  ;;  %517 = vmatpush.bf16.msra.mxu0 %v1925_v4  ;;  %v1938_v21 = vld [vmem:[%s2403_s4 + $0x38] sm:$0xff]  ;;  %s462_s16 = scalar_lea.vmem %s2411_s12, %s2414_s27 }
  0x1a   : > { %557 = vmatpush.bf16.msra.mxu1 %v1921_v5  ;;  %v1545_v13 = vor.u32 %v1918_v8, %v1544_v7  ;;  %v1919_v17 = vld [vmem:[#allocation6] sm:$0xff]  ;;  %v1953_v27 = vld [vmem:[%s2403_s4 + $0xb0] sm:$0xff]  ;;  %v1936_v29 = vld [vmem:[%s2403_s4 + $0x28] sm:$0xff]  ;;  %886 = vst [vmem:[#allocation3] sm:$0x3f] %v2122_v40 }
  0x1b   : > { %618 = vmatpush.bf16.msra.mxu2 %v1929_v6  ;;  %v1927_v20 = vld [vmem:[#allocation6 + $0x40] sm:$0xff]  ;;  %v1952_v30 = vld [vmem:[%s2403_s4 + $0xa8] sm:$0xff]  ;;  %v1941_v37 = vld [vmem:[%s2403_s4 + $0x50] sm:$0xff]  ;;  %1137 = vst [vmem:[#allocation4] sm:$0xf] %v2122_v40 }
  0x1c   : > { %v582_v15 = vshll.u32 %v1545_v13, 16  ;;  %v580_v18 = vshrl.u32 %v1545_v13, 16  ;;  %727 = vmatpush.bf16.msra.mxu3 %v1945_v14  ;;  %v1954_v22 = vld [vmem:[%s2403_s4 + $0xb8] sm:$0xff]  ;;  %v465_v23 = vld [vmem:[%s459_s13] sm:$0xf]  ;;  %v1933_v38 = vld [vmem:[%s2403_s4 + $0x10] sm:$0xff] }
  0x1d   : > { %518 = vmatpush.bf16.msra.mxu0 %v1924_v10  ;;  %v464_v24 = vld [vmem:[%s2224_s22] sm:$0xf]  ;;  %v1942_v34 = vld [vmem:[%s2403_s4 + $0x58] sm:$0xff]  ;;  %v1949_v39 = vld [vmem:[%s2403_s4 + $0x90] sm:$0xff] }
  0x1e   : > { %558 = vmatpush.bf16.msra.mxu1 %v1920_v11  ;;  %v584_v19 = vrot.slane %v582_v15, 1  ;;  %v1943_v31 = vld [vmem:[%s2403_s4 + $0x60] sm:$0xff]  ;;  %v1934_v35 = vld [vmem:[%s2403_s4 + $0x18] sm:$0xff]  ;;  %v1940_v41 = vld [vmem:[%s2403_s4 + $0x48] sm:$0xff] }
  0x1f   : > { %619 = vmatpush.bf16.msra.mxu2 %v1928_v12  ;;  %v1935_v32 = vld [vmem:[%s2403_s4 + $0x20] sm:$0xff]  ;;  %v1950_v36 = vld [vmem:[%s2403_s4 + $0x98] sm:$0xff]  ;;  %v1932_v42 = vld [vmem:[%s2403_s4 + $0x8] sm:$0xff] }
  0x20   : > { %v585_v25 = vor.u32 %v584_v19, %v580_v18  ;;  %728 = vmatpush.bf16.msra.mxu3 %v1944_v28  ;;  %v1951_v33 = vld [vmem:[%s2403_s4 + $0xa0] sm:$0xff]  ;;  %v1948_v43 = vld [vmem:[%s2403_s4 + $0x88] sm:$0xff]  ;;  %v1970_v47 = vld [vmem:[%s2405_s6 + $0x78] sm:$0xff] }
  0x21   : > { %519 = vmatpush.bf16.msra.mxu0 %v1923_v16  ;;  %v1939_v44 = vld [vmem:[%s2403_s4 + $0x40] sm:$0xff]  ;;  %v1962_v48 = vld [vmem:[%s2405_s6 + $0x38] sm:$0xff]  ;;  %v1969_v4 = vld [vmem:[%s2405_s6 + $0x70] sm:$0xff] }
  0x22   : > { %559 = vmatpush.bf16.msra.mxu1 %v1919_v17  ;;  %v1931_v45 = vld [vmem:[%s2403_s4] sm:$0xff]  ;;  %v1978_v49 = vld [vmem:[%s2405_s6 + $0xb8] sm:$0xff]  ;;  %v1961_v5 = vld [vmem:[%s2405_s6 + $0x30] sm:$0xff] }
  0x23   : > { %620 = vmatpush.bf16.msra.mxu2 %v1927_v20  ;;  %v1947_v46 = vld [vmem:[%s2403_s4 + $0x80] sm:$0xff]  ;;  %v1977_v6 = vld [vmem:[%s2405_s6 + $0xb0] sm:$0xff]  ;;  %v1968_v7 = vld [vmem:[%s2405_s6 + $0x68] sm:$0xff] }
  0x24   : > { %1524 = vmatmul.msk.bf16.vlgmr.msra.gmra.mxu0 %vm508_vm0, %v465_v23  ;;  %729 = vmatpush.bf16.msra.mxu3 %v1943_v31  ;;  %v2035_v53 = vld [vmem:[%s2402_s3] ss:$0 sm:$0xff]  ;;  %v1960_v8 = vld [vmem:[%s2405_s6 + $0x28] sm:$0xff]  ;;  %v1966_v13 = vld [vmem:[%s2405_s6 + $0x58] sm:$0xff] }
  0x25   : > { %787 = vmatpush.bf16.msrb.mxu0 %v1938_v21  ;;  %1541 = vmatmul.msk.bf16.vlgmr.msra.gmra.mxu1 %vm508_vm0, %v464_v24  ;;  %v1976_v9 = vld [vmem:[%s2405_s6 + $0xa8] sm:$0xff]  ;;  %v1967_v10 = vld [vmem:[%s2405_s6 + $0x60] sm:$0xff]  ;;  %v1958_v14 = vld [vmem:[%s2405_s6 + $0x18] sm:$0xff] }
  0x26   : > { %865 = vmatpush.bf16.msrb.mxu1 %v1954_v22  ;;  %1562 = vmatmul.msk.bf16.vlgmr.msra.gmra.mxu2 %vm508_vm0, %v585_v25  ;;  %v1959_v11 = vld [vmem:[%s2405_s6 + $0x20] sm:$0xff]  ;;  %v1974_v15 = vld [vmem:[%s2405_s6 + $0x98] sm:$0xff]  ;;  %v1965_v16 = vld [vmem:[%s2405_s6 + $0x50] sm:$0xff] }
  0x27   : > { %977 = vmatpush.bf16.msrb.mxu2 %v1970_v47  ;;  %v1975_v12 = vld [vmem:[%s2405_s6 + $0xa0] sm:$0xff]  ;;  %v1957_v17 = vld [vmem:[%s2405_s6 + $0x10] sm:$0xff]  ;;  %v1964_v19 = vld [vmem:[%s2405_s6 + $0x48] sm:$0xff] }
  0x28   : > { %730 = vmatpush.bf16.msra.mxu3 %v1942_v34  ;;  %v1973_v18 = vld [vmem:[%s2405_s6 + $0x90] sm:$0xff]  ;;  %v1956_v20 = vld [vmem:[%s2405_s6 + $0x8] sm:$0xff]  ;;  %v1963_v22 = vld [vmem:[%s2405_s6 + $0x40] sm:$0xff] }
  0x29   : > { %788 = vmatpush.bf16.msrb.mxu0 %v1937_v26  ;;  %v1972_v21 = vld [vmem:[%s2405_s6 + $0x88] sm:$0xff]  ;;  %v1955_v23 = vld [vmem:[%s2405_s6] sm:$0xff]  ;;  %v1986_v25 = vld [vmem:[#allocation8 + $0x38] sm:$0xff] }
  0x2a   : > { %866 = vmatpush.bf16.msrb.mxu1 %v1953_v27  ;;  %v1971_v24 = vld [vmem:[%s2405_s6 + $0x80] sm:$0xff]  ;;  %v1994_v26 = vld [vmem:[#allocation8 + $0x78] sm:$0xff]  ;;  %v1985_v28 = vld [vmem:[#allocation8 + $0x30] sm:$0xff] }
  0x2b   : > { %978 = vmatpush.bf16.msrb.mxu2 %v1969_v4  ;;  %v2002_v27 = vld [vmem:[#allocation8 + $0xb8] sm:$0xff]  ;;  %v1984_v31 = vld [vmem:[#allocation8 + $0x28] sm:$0xff]  ;;  %v1995_v4 = vld [vmem:[#allocation8 + $0x80] sm:$0xff] }
  0x2c   : > { %731 = vmatpush.bf16.msra.mxu3 %v1941_v37 }
  0x2d   : > { %789 = vmatpush.bf16.msrb.mxu0 %v1936_v29 }
  0x2e   : > { %867 = vmatpush.bf16.msrb.mxu1 %v1952_v30 }
  0x2f   : > { %979 = vmatpush.bf16.msrb.mxu2 %v1968_v7 }
  0x30   : > { %732 = vmatpush.bf16.msra.mxu3 %v1940_v41 }
  0x31   : > { %790 = vmatpush.bf16.msrb.mxu0 %v1935_v32 }
  0x32   : > { %868 = vmatpush.bf16.msrb.mxu1 %v1951_v33  ;;  %v1983_v33 = vld [vmem:[#allocation8 + $0x20] sm:$0xff] }
  0x33   : > { %980 = vmatpush.bf16.msrb.mxu2 %v1967_v10 }
  0x34   : > { %733 = vmatpush.bf16.msra.mxu3 %v1939_v44 }
  0x35   : > { %791 = vmatpush.bf16.msrb.mxu0 %v1934_v35  ;;  %v2036_v35 = vld [vmem:[%s2404_s5] ss:$0 sm:$0xff] }
  0x36   : > { %869 = vmatpush.bf16.msrb.mxu1 %v1950_v36 }
  0x37   : > { %981 = vmatpush.bf16.msrb.mxu2 %v1966_v13 }
  0x38   : > { %1038 = vmatpush.bf16.msrb.mxu3 %v1962_v48 }
  0x39   : > { %792 = vmatpush.bf16.msrb.mxu0 %v1933_v38 }
  0x3a   : > { %870 = vmatpush.bf16.msrb.mxu1 %v1949_v39 }
  0x3b   : > { %982 = vmatpush.bf16.msrb.mxu2 %v1965_v16 }
  0x3c   : > { %1039 = vmatpush.bf16.msrb.mxu3 %v1961_v5 }
  0x3d   : > { %793 = vmatpush.bf16.msrb.mxu0 %v1932_v42 }
  0x3e   : > { %871 = vmatpush.bf16.msrb.mxu1 %v1948_v43 }
  0x3f   : > { %983 = vmatpush.bf16.msrb.mxu2 %v1964_v19 }
  0x40   : > { %1040 = vmatpush.bf16.msrb.mxu3 %v1960_v8 }
  0x41   : > { %794 = vmatpush.bf16.msrb.mxu0 %v1931_v45 }
  0x42   : > { %872 = vmatpush.bf16.msrb.mxu1 %v1947_v46 }
  0x43   : > { %984 = vmatpush.bf16.msrb.mxu2 %v1963_v22 }
  0x44   : > { %1041 = vmatpush.bf16.msrb.mxu3 %v1959_v11 }
  0x45   : > { %1116 = vmatpush.bf16.msra.mxu0 %v1978_v49  ;;  %v1993_v49 = vld [vmem:[#allocation8 + $0x70] sm:$0xff] }
  0x46   : > { %1228 = vmatpush.bf16.msra.mxu1 %v1994_v26  ;;  %v1381_v26 = vld [vmem:[%s2408_s9] sm:$0x1] }
  0x47   : > { %1289 = vmatpush.bf16.msra.mxu2 %v1986_v25 }
  0x48   : > { %1042 = vmatpush.bf16.msrb.mxu3 %v1958_v14 }
  0x49   : > { %1117 = vmatpush.bf16.msra.mxu0 %v1977_v6 }
  0x4a   : > { %1229 = vmatpush.bf16.msra.mxu1 %v1993_v49 }
  0x4b   : > { %1290 = vmatpush.bf16.msra.mxu2 %v1985_v28 }
  0x4c   : > { %1043 = vmatpush.bf16.msrb.mxu3 %v1957_v17 }
  0x4d   : > { %1118 = vmatpush.bf16.msra.mxu0 %v1976_v9  ;;  %v2037_v9 = vld [vmem:[%s2406_s7] ss:$0 sm:$0xff] }
  0x4f   : > { %1291 = vmatpush.bf16.msra.mxu2 %v1984_v31  ;;  %v1385_v31 = vld [vmem:[%s2409_s10] sm:$0x1] }
  0x50   : > { %1044 = vmatpush.bf16.msrb.mxu3 %v1956_v20 }
  0x51   : > { %1119 = vmatpush.bf16.msra.mxu0 %v1975_v12 }
  0x53   : > { %1292 = vmatpush.bf16.msra.mxu2 %v1983_v33 }
  0x54   : > { %1045 = vmatpush.bf16.msrb.mxu3 %v1955_v23 }
  0x55   : > { %1120 = vmatpush.bf16.msra.mxu0 %v1974_v15 }
  0x59   : > { %1121 = vmatpush.bf16.msra.mxu0 %v1973_v18 }
  0x5d   : > { %1122 = vmatpush.bf16.msra.mxu0 %v1972_v21 }
  0x61   : > { %1123 = vmatpush.bf16.msra.mxu0 %v1971_v24 }
  0xa1   : > { %v521_v50 = vpop.f32.mrf.mxu0 }
  0xa2   : > { %v561_v51 = vpop.f32.mrf.mxu1 }
  0xa3   : > { %v562_v52 = vadd.f32 %v561_v51, %v521_v50  ;;  %v2001_v50 = vld [vmem:[#allocation8 + $0xb0] sm:$0xff]  ;;  %v1982_v51 = vld [vmem:[#allocation8 + $0x18] sm:$0xff] }
  0xa4   : > { %1293 = vmatpush.bf16.msra.mxu2 %v1982_v51 }
  0xa9   : > { %v622_v54 = vpop.f32.mrf.mxu2  ;;  %v523_v56 = vpop.f32.mrf.mxu0 }
  0xaa   : > { %v626_v55 = vadd.f32 %v622_v54, %v562_v52  ;;  %v563_v57 = vpop.f32.mrf.mxu1  ;;  %v1992_v52 = vld [vmem:[#allocation8 + $0x68] sm:$0xff]  ;;  %v1981_v54 = vld [vmem:[#allocation8 + $0x10] sm:$0xff]  ;;  %v1999_v56 = vld [vmem:[#allocation8 + $0xa0] sm:$0xff] }
  0xab   : > { %1230 = vmatpush.bf16.msra.mxu1 %v1992_v52  ;;  %1294 = vmatpush.bf16.msra.mxu2 %v1981_v54  ;;  %v1980_v57 = vld [vmem:[#allocation8 + $0x8] sm:$0xff] }
  0xac   : > { %v631_v58 = vadd.f32 %v2035_v53, %v626_v55  ;;  %v2000_v53 = vld [vmem:[#allocation8 + $0xa8] sm:$0xff]  ;;  %v1991_v55 = vld [vmem:[#allocation8 + $0x60] sm:$0xff] }
  0xae   : > { %v632_v59 = vmul.f32 0.2, %v631_v58 }
  0xaf   : > { %1231 = vmatpush.bf16.msra.mxu1 %v1991_v55  ;;  %1295 = vmatpush.bf16.msra.mxu2 %v1980_v57 }
  0xb0   : > { %v633_v60 = vmax.f32 %v631_v58, %v632_v59  ;;  %v1990_v58 = vld [vmem:[#allocation8 + $0x58] sm:$0xff] }
  0xb1   : > { %v624_v61 = vpop.f32.mrf.mxu2  ;;  %v1998_v59 = vld [vmem:[#allocation8 + $0x98] sm:$0xff] }
  0xb2   : > { %636 = vst [vmem:[#allocation2 + $0x1] sm:$0xff] %v633_v60  ;;  %v1979_v60 = vld [vmem:[#allocation8] sm:$0xff]  ;;  %v1989_v61 = vld [vmem:[#allocation8 + $0x50] sm:$0xff] }
  0xb3   : > { %1232 = vmatpush.bf16.msra.mxu1 %v1990_v58  ;;  %1296 = vmatpush.bf16.msra.mxu2 %v1979_v60 }
  0xb7   : > { %1233 = vmatpush.bf16.msra.mxu1 %v1989_v61 }
  0xb9   : > { %v640_v62 = vld [vmem:[#allocation2 + $0x1] ss:$2 sm:$0xf]  ;;  %v637_v63 = vld [vmem:[#allocation2] ss:$2 sm:$0xf] }
  0xba   : > { %v641_v0 = vpack.c.bf16 %v640_v62, %v640_v62  ;;  %v638_v1 = vpack.c.bf16 %v637_v63, %v637_v63  ;;  %v643_v2 = vld [vmem:[#allocation2 + $0x2] ss:$2 sm:$0xf]  ;;  %v1997_v62 = vld [vmem:[#allocation8 + $0x90] sm:$0xff] }
  0xbb   : > { %v644_v3 = vpack.c.bf16 %v643_v2, %v643_v2  ;;  %v1139_v63 = vld [vmem:[#allocation4] ss:$2 sm:$0x1]  ;;  %v1996_v2 = vld [vmem:[#allocation8 + $0x88] sm:$0xff] }
  0xbc   : > { %734 = vmatmul.bf16.vlgmr.msra.gmra.mxu3 %v641_v0  ;;  %795 = vmatmul.bf16.vlgmr.msrb.gmra.mxu0 %v638_v1  ;;  %v1140_v0 = vpack.c.bf16 %v1139_v63, %v1139_v63  ;;  %v1988_v1 = vld [vmem:[#allocation8 + $0x48] sm:$0xff] }
  0xbd   : > { %873 = vmatmul.bf16.vlgmr.msrb.gmra.mxu1 %v644_v3  ;;  %1367 = vmatpush.bf16.msra.mxu3 %v2002_v27  ;;  %v1987_v3 = vld [vmem:[#allocation8 + $0x40] sm:$0xff] }
  0xbe   : > { %1234 = vmatpush.bf16.msra.mxu1 %v1988_v1 }
  0xc1   : > { %1368 = vmatpush.bf16.msra.mxu3 %v2001_v50 }
  0xc2   : > { %1235 = vmatpush.bf16.msra.mxu1 %v1987_v3 }
  0xc5   : > { %1369 = vmatpush.bf16.msra.mxu3 %v2000_v53 }
  0xc9   : > { %1370 = vmatpush.bf16.msra.mxu3 %v1999_v56 }
  0xcd   : > { %1371 = vmatpush.bf16.msra.mxu3 %v1998_v59 }
  0xd1   : > { %1372 = vmatpush.bf16.msra.mxu3 %v1997_v62 }
  0xd5   : > { %1373 = vmatpush.bf16.msra.mxu3 %v1996_v2 }
  0xd9   : > { %1374 = vmatpush.bf16.msra.mxu3 %v1995_v4 }
 0x139   : > { %v796_v29 = vpop.f32.mrf.mxu0 }
 0x13a   : > { %v874_v30 = vpop.f32.mrf.mxu1 }
 0x13f   : > { %v735_v32 = vpop.f32.mrf.mxu3 }
 0x140   : > { %v797_v34 = vadd.f32 %v796_v29, %v735_v32 }
 0x141   : > { %v798_v36 = vpop.f32.mrf.mxu0 }
 0x142   : > { %v878_v37 = vadd.f32 %v874_v30, %v797_v34  ;;  %v876_v38 = vpop.f32.mrf.mxu1  ;;  %v1392_v36 = vld [vmem:[#allocation5] sm:$0x1] }
 0x144   : > { %v883_v39 = vadd.f32 %v2036_v35, %v878_v37 }
 0x146   : > { %v884_v40 = vmul.f32 0.2, %v883_v39 }
 0x147   : > { %v737_v41 = vpop.f32.mrf.mxu3 }
 0x148   : > { %v885_v42 = vmax.f32 %v883_v39, %v884_v40 }
 0x14a   : > { %887 = vst [vmem:[#allocation3 + $0x1] sm:$0xf] %v885_v42 }
 0x151   : > { %v891_v43 = vld [vmem:[#allocation3 + $0x1] ss:$2 sm:$0x3]  ;;  %v888_v44 = vld [vmem:[#allocation3] ss:$2 sm:$0x3] }
 0x152   : > { %v892_v45 = vpack.c.bf16 %v891_v43, %v891_v43  ;;  %v889_v46 = vpack.c.bf16 %v888_v44, %v888_v44  ;;  %v894_v47 = vld [vmem:[#allocation3 + $0x2] ss:$2 sm:$0x3] }
 0x153   : > { %v895_v48 = vpack.c.bf16 %v894_v47, %v894_v47 }
 0x154   : > { %985 = vmatmul.bf16.vlgmr.msrb.gmra.mxu2 %v892_v45  ;;  %1046 = vmatmul.bf16.vlgmr.msrb.gmra.mxu3 %v889_v46 }
 0x155   : > { %1124 = vmatmul.bf16.vlgmr.msra.gmra.mxu0 %v895_v48 }
 0x164   : > { %1297 = vmatmul.bf16.vlgmr.msra.gmra.mxu2 %v1140_v0 }
 0x1d2   : > { %v1125_v5 = vpop.f32.mrf.mxu0 }
 0x1d7   : > { %v986_v6 = vpop.f32.mrf.mxu2  ;;  %v1047_v7 = vpop.f32.mrf.mxu3 }
 0x1d8   : > { %v1048_v8 = vadd.f32 %v1047_v7, %v986_v6 }
 0x1da   : > { %v1129_v10 = vadd.f32 %v1125_v5, %v1048_v8  ;;  %v1127_v11 = vpop.f32.mrf.mxu0 }
 0x1dc   : > { %v1134_v12 = vadd.f32 %v2037_v9, %v1129_v10 }
 0x1de   : > { %v1135_v13 = vmul.f32 0.2, %v1134_v12 }
 0x1df   : > { %v988_v14 = vpop.f32.mrf.mxu2  ;;  %v1049_v15 = vpop.f32.mrf.mxu3 }
 0x1e0   : > { %v1136_v16 = vmax.f32 %v1134_v12, %v1135_v13 }
 0x1e2   : > { %1138 = vst [vmem:[#allocation4 + $0x1] sm:$0x3] %v1136_v16 }
 0x1e7   : > { %v1298_v21 = vpop.f32.mrf.mxu2 }
 0x1e9   : > { %v1142_v17 = vld [vmem:[#allocation4 + $0x1] ss:$2 sm:$0x1]  ;;  %v1145_v18 = vld [vmem:[#allocation4 + $0x2] ss:$2 sm:$0x1] }
 0x1ea   : > { %v1143_v19 = vpack.c.bf16 %v1142_v17, %v1142_v17  ;;  %v1146_v20 = vpack.c.bf16 %v1145_v18, %v1145_v18 }
 0x1ec   : > { %1236 = vmatmul.bf16.vlgmr.msra.gmra.mxu1 %v1143_v19  ;;  %1375 = vmatmul.bf16.vlgmr.msra.gmra.mxu3 %v1146_v20 }
 0x1ef   : > { %v1300_v22 = vpop.f32.mrf.mxu2 }
 0x269   : > { %v1237_v23 = vpop.f32.mrf.mxu1 }
 0x26a   : > { %v1299_v24 = vadd.f32 %v1298_v21, %v1237_v23 }
 0x26f   : > { %v1376_v25 = vpop.f32.mrf.mxu3 }
 0x270   : > { %v1380_v27 = vadd.f32 %v1376_v25, %v1299_v24 }
 0x271   : > { %v1239_v28 = vpop.f32.mrf.mxu1 }
 0x272   : > { %v1382_v29 = vadd.f32 %v1381_v26, %v1380_v27 }
 0x274   : > { %v1383_v30 = vmul.f32 0.2, %v1382_v29 }
 0x276   : > { %v1384_v32 = vmax.f32 %v1382_v29, %v1383_v30 }
 0x277   : > { %v1378_v33 = vpop.f32.mrf.mxu3 }
 0x278   : > { %v1386_v34 = vmul.f32 %v1385_v31, %v1384_v32 }
 0x27a   : > { %v1388_v35 = vsel %vm1387_vm1, %v1386_v34, 0.0 }
 0x27b   : > { %1389 = vadd.xlane.f32.xlu0 %v1388_v35 }
 0x2ee   : > { %v1390_v37 = vpop.xlane.xlu0 %1389 }
 0x2ef   : > { %v1393_v38 = vadd.f32 %v1392_v36, %v1390_v37 }
 0x2f1   : > { %v1394_v39 = vsub.f32 0.0, %v1393_v38 }
 0x2f3   : > { %v1395_v40 = vmul.f32 1.442695, %v1394_v39 }
 0x2f5   : > { %2038 = vpow2.f32 %v1395_v40 }
 0x2fb   : > { %v2039_v41 = vpop.eup %2038 }
 0x2fc   : > { %v1397_v42 = vadd.f32 1.0, %v2039_v41 }
 0x2fe   : > { %2040 = vrcp.f32 %v1397_v42  ;;  %v1409_v46 = vand.u32 2147483648, %v1397_v42  ;;  %v1407_v48 = vand.u32 2147483647, %v1397_v42  ;;  %vm1403_vm3 = vweird.f32 %v1397_v42 }
 0x300   : > { %v1410_v50 = vor.u32 1.1754944e-38, %v1409_v46  ;;  %vm1408_vm6 = vcmp.eq.f32.partialorder %v1407_v48, 8.507059e+37 }
 0x304   : > { %v2041_v43 = vpop.eup %2040 }
 0x305   : > { %v1399_v44 = vmul.f32 %v2041_v43, %v1397_v42  ;;  %vm1404_vm2 = vweird.f32 %v2041_v43 }
 0x306   : > { %vm1405_vm4 = vmor %vm1403_vm3, %vm1404_vm2 }
 0x307   : > { %v1400_v45 = vsub.f32 1.0, %v1399_v44 }
 0x309   : > { %v1401_v47 = vmul.f32 %v2041_v43, %v1400_v45 }
 0x30b   : > { %v1402_v49 = vadd.f32 %v2041_v43, %v1401_v47 }
 0x30d   : > { %v1406_v51 = vsel %vm1405_vm4, %v2041_v43, %v1402_v49 }
 0x30e   : > { %v1411_v52 = vsel %vm1408_vm6, %v1410_v50, %v1406_v51 }
 0x30f   : > { %1414 = vst.msk [vmem:[%s462_s16] sm:$0x1] %vm1413_vm5, %v1411_v52 }
 0x310 PF: > { %s26_s23 = sadd.s32 1, %s2116_s23  }
 0x311   : > { %p23_p7 = scmp.ge.s32.totalorder %s26_s23, 4  }
 0x313   :  { %25 = sbr.rel (!%p23_p7) target bundleno = 5 (0x5), region = 124 }
 0x318   :  { %1432 = vsyncpa [#allocation7], 1 }
 0x319   :  { %1434 = vsyncpa [#allocation7 + $0x1], 1 }
 0x31a   :  { %1435 = vsyncpa [#allocation9], 1 }

</bundles_post_ra>
